<compile_context>
chip_gen: v7x
topology: tpu7x:2x2x1
jax: 0.10.0
libtpu: 0.0.40
codegen_flags: <defaults>
</compile_context>

<pallas_src>
import functools

import jax
import jax.numpy as jnp
import numpy as np
from jax.experimental import pallas as pl
from jax.experimental.pallas import tpu as pltpu

# ----------------------------- problem sizes --------------------------------
N_BATCH    = 2     # N  : regional point clouds
P_REP      = 8     # P  : representative points per cloud
DIMS       = 3     # spatial dimensionality
K_NBR      = 4     # K  : neighbors per representative point
C_IN       = 4     # input feature dim
C_MID      = 8     # lifted feature dim
C_OUT      = 16    # output feature dim
DEPTH_MULT = 2     # depth multiplier of the separable conv

CF    = C_MID + C_IN          # concatenated feature dim           (12)
Q_DW  = CF * DEPTH_MULT       # depthwise-conv output channels     (24)
KK    = K_NBR * K_NBR         # x-transform channels               (16)
KD    = K_NBR * DIMS          # packed local-coordinate lanes      (12)
KCM   = K_NBR * C_MID         # packed lifted-feature lanes        (32)
KCI   = K_NBR * C_IN          # packed input-feature lanes         (16)
KKCM  = KK * C_MID            # expanded h lanes                   (128)
KKCI  = KK * C_IN             # expanded fts lanes                 (64)

# ------------------------- packed input lane layout --------------------------
U_PTS   = 0                   # lanes  0:12  pts,  lane k*DIMS+d
U_REP   = 16                  # lanes 16:19  rep point
U_FTS   = 32                  # lanes 32:48  fts,  lane k*C_IN+c
U_LANES = 48

W_A = KK + KCM                # stage-A output lanes  [t | h1]          (48)
W_B = KKCM + KK               # stage-B output lanes  [h_tiled | t2]    (144)
W_E = KKCM + KKCI             # expansion lanes       [xh | xf]         (192)

# ------------------------- parameter slab layout ------------------------------
# One (SLAB_ROWS, 256) bf16 slab; every block starts at a 16-aligned row,
# column offset 0, so in-kernel slices are cheap static reads.
R_WA   = 0                    # (48,  48)   packed-input -> [t_pre | h1_pre]
R_WTF  = 48                   # (48,  64)   packed-input -> tile(fts)  (0/1)
R_WB   = 96                   # (48, 144)   [t | h1]     -> [h_tiled | t2_pre]
R_WXE  = 144                  # (16, 192)   t2 -> X -> lane expansion (fused)
R_WDP  = 160                  # (192, 16)   depthwise (.) pointwise (fused)
R_BA   = 352                  # (1,  48)
R_BB   = 368                  # (1, 144)
R_BXE  = 384                  # (1, 192)
R_BO   = 400                  # (1,  16)
SLAB_ROWS  = 416
SLAB_LANES = 256


# ------------------------------- kernel --------------------------------------
def xconv_kernel(u_ref, w_ref, out_ref):
    f32 = jnp.float32
    bf16 = jnp.bfloat16

    def mm(a, b):  # bf16 MXU matmul, f32 accumulation
        return jnp.dot(a.astype(bf16), b, preferred_element_type=f32)

    u = u_ref[...]                                               # (TM, 48) f32

    # ---- stage A: x-trans conv + dense1, rep subtraction folded into WA -----
    wa = w_ref[R_WA:R_WA + U_LANES, 0:W_A]
    ba = w_ref[R_BA:R_BA + 1, 0:W_A].astype(f32)
    a = jnp.maximum(mm(u, wa) + ba, 0.0)                         # (TM, 48) [t|h1]

    # tile(fts): exact 0/1 replication done on the MXU (no lane concats)
    wtf = w_ref[R_WTF:R_WTF + U_LANES, 0:KKCI]
    fts_t = mm(u, wtf)                                           # (TM, 64)

    # ---- stage B: x-trans dense1 + dense2 (dense2 column-tiled over K) ------
    wb = w_ref[R_WB:R_WB + W_A, 0:W_B]
    bb = w_ref[R_BB:R_BB + 1, 0:W_B].astype(f32)
    b = jnp.maximum(mm(a, wb) + bb, 0.0)                         # (TM, 144)
    h_t = b[:, 0:KKCM]                                           # (TM, 128) tile(h)
    t2 = b[:, KKCM:KKCM + KK]                                    # (TM, 16)

    # ---- stage C: x-trans dense2 (no act) fused with the 0/1 lane expansion --
    wxe = w_ref[R_WXE:R_WXE + KK, 0:W_E]
    bxe = w_ref[R_BXE:R_BXE + 1, 0:W_E].astype(f32)
    xhf = mm(t2, wxe) + bxe                                      # (TM, 192) [xh|xf]

    # ---- stage D: fts_X = X @ fts_cat  +  depthwise + pointwise, fused -------
    yhf = xhf * jnp.concatenate([h_t, fts_t], axis=-1)           # f32 VPU, 128-aligned
    wdp = w_ref[R_WDP:R_WDP + W_E, 0:C_OUT]
    bo = w_ref[R_BO:R_BO + 1, 0:C_OUT].astype(f32)
    out = jnp.maximum(mm(yhf, wdp) + bo, 0.0)                    # (TM, C_OUT)
    out_ref[...] = out.astype(out_ref.dtype)


# ------------------------------- wrapper --------------------------------------
def xconv_pallas(rep_pt, pts, fts, slab, *, tm=256):
    n, p = rep_pt.shape[0], rep_pt.shape[1]
    m = n * p

    # Pack pts / rep / fts into one lane-aligned (M, 48) slab -> single DMA.
    u = jnp.zeros((m, U_LANES), jnp.float32)
    u = u.at[:, U_PTS:U_PTS + KD].set(pts.reshape(m, KD))
    u = u.at[:, U_REP:U_REP + DIMS].set(rep_pt.reshape(m, DIMS))
    u = u.at[:, U_FTS:U_FTS + KCI].set(fts.reshape(m, KCI))

    # Point-axis tile: multiple of 8, <= padded M; pad rows so M % tm == 0.
    tm = max(8, (min(tm, pl.cdiv(m, 8) * 8) // 8) * 8)
    m_pad = pl.cdiv(m, tm) * tm
    if m_pad != m:
        u = jnp.pad(u, ((0, m_pad - m), (0, 0)))
    grid = (m_pad // tm,)

    out = pl.pallas_call(
        xconv_kernel,
        out_shape=jax.ShapeDtypeStruct((m_pad, C_OUT), jnp.float32),
        grid=grid,
        in_specs=[
            pl.BlockSpec((tm, U_LANES), lambda i: (i, 0)),
            pl.BlockSpec((SLAB_ROWS, SLAB_LANES), lambda i: (0, 0)),
        ],
        out_specs=pl.BlockSpec((tm, C_OUT), lambda i: (i, 0)),
        compiler_params=pltpu.CompilerParams(
            dimension_semantics=("parallel",),
            vmem_limit_bytes=32 * 1024 * 1024),
    )(u, slab)
    return out[:m].reshape(n, p, C_OUT)


xconv_pallas_jit = jax.jit(xconv_pallas, static_argnames=("tm",))


# ----------------------- parameter packing / reference ------------------------
def pack_params(raw):
    f32 = jnp.float32
    eye_k = jnp.eye(K_NBR, dtype=f32)

    # Base weights in packed-lane layouts (lane k*stride+c conventions).
    wck = jnp.transpose(raw['xc_w'][:, :, 0, :], (2, 1, 0)).reshape(KD, KK)
    wt1 = raw['xd1_w'].T                                     # (KK, KK)
    wt2 = raw['xd2_w'].T                                     # (KK, KK)
    w1 = jnp.kron(eye_k, raw['d1_w'].T)                      # (KD, KCM)  block-diag over K
    w2 = jnp.kron(eye_k, raw['d2_w'].T)                      # (KCM, KCM) block-diag over K
    b1 = jnp.tile(raw['d1_b'], K_NBR)                        # (KCM,)
    b2 = jnp.tile(raw['d2_b'], K_NBR)                        # (KCM,)

    # rep -> K-replicated-lane 0/1 map (T_r[d, k*DIMS+d] = 1).
    t_r = jnp.tile(jnp.eye(DIMS, dtype=f32), (1, K_NBR))     # (DIMS, KD)

    # Stage A: u -> [t_pre | h1_pre], rep subtraction folded in.
    w_tp = jnp.concatenate([wck, w1], axis=1)                # (KD, 48)
    wa = jnp.zeros((U_LANES, W_A), f32)
    wa = wa.at[U_PTS:U_PTS + KD, :].set(w_tp)
    wa = wa.at[U_REP:U_REP + DIMS, :].set(-(t_r @ w_tp))
    ba = jnp.concatenate([raw['xc_b'], b1])                  # (48,)

    # tile(fts) 0/1 replication matrix acting on the packed input.
    wtf = jnp.zeros((U_LANES, KKCI), f32)
    wtf = wtf.at[U_FTS:U_FTS + KCI, :].set(
        jnp.tile(jnp.eye(KCI, dtype=f32), (1, K_NBR)))

    # Stage B: [t | h1] -> [h_tiled(128) | t2_pre(16)].
    wb = jnp.zeros((W_A, W_B), f32)
    wb = wb.at[KK:KK + KCM, 0:KKCM].set(jnp.tile(w2, (1, K_NBR)))
    wb = wb.at[0:KK, KKCM:KKCM + KK].set(wt1)
    bb = jnp.concatenate([jnp.tile(b2, K_NBR), raw['xd1_b']])   # (144,)

    # Stage C: x-trans dense2 (no activation) fused with the 0/1 expansion.
    eh = jnp.kron(jnp.eye(KK, dtype=f32), jnp.ones((1, C_MID), f32))   # (KK, KKCM)
    ef = jnp.kron(jnp.eye(KK, dtype=f32), jnp.ones((1, C_IN), f32))    # (KK, KKCI)
    e = jnp.concatenate([eh, ef], axis=1)                               # (KK, 192)
    wxe = wt2 @ e                                                       # (KK, 192)
    bxe = raw['xd2_b'] @ e                                              # (192,)

    # Stage D: depthwise (1,K) conv weights expanded to lane space, then fused
    # with the pointwise conv into one (192, C_OUT) contraction.
    dwf = raw['dw_w'][:, 0, 0, :]                              # (Q, K): dwf[q, i]
    qc = jnp.arange(Q_DW) // DEPTH_MULT
    dh = (qc[None, :] == jnp.arange(C_MID)[:, None]).astype(f32)            # (C_MID, Q)
    df = (qc[None, :] == (C_MID + jnp.arange(C_IN))[:, None]).astype(f32)   # (C_IN, Q)
    wdh = jnp.einsum('qi,cq->icq', dwf, dh)
    wdh = jnp.broadcast_to(wdh[:, None], (K_NBR, K_NBR, C_MID, Q_DW)).reshape(KKCM, Q_DW)
    wdf = jnp.einsum('qi,cq->icq', dwf, df)
    wdf = jnp.broadcast_to(wdf[:, None], (K_NBR, K_NBR, C_IN, Q_DW)).reshape(KKCI, Q_DW)
    wp = raw['pw_w'][:, :, 0, 0].T                             # (Q, C_OUT)
    wdp = jnp.concatenate([wdh, wdf], axis=0) @ wp             # (192, C_OUT)
    bo = raw['dw_b'] @ wp                                      # (C_OUT,)

    slab = jnp.zeros((SLAB_ROWS, SLAB_LANES), f32)

    def put(s, r, mat):
        mat = jnp.asarray(mat, f32)
        if mat.ndim == 1:
            mat = mat[None, :]
        return s.at[r:r + mat.shape[0], 0:mat.shape[1]].set(mat)

    slab = put(slab, R_WA, wa)
    slab = put(slab, R_WTF, wtf)
    slab = put(slab, R_WB, wb)
    slab = put(slab, R_WXE, wxe)
    slab = put(slab, R_WDP, wdp)
    slab = put(slab, R_BA, ba)
    slab = put(slab, R_BB, bb)
    slab = put(slab, R_BXE, bxe)
    slab = put(slab, R_BO, bo)
    return slab.astype(jnp.bfloat16)


def xconv_reference(rep_pt, pts, fts, raw):
    hi = jax.lax.Precision.HIGHEST
    pts_local = pts - rep_pt[:, :, None, :]
    h = jax.nn.relu(jnp.einsum('npkd,od->npko', pts_local, raw['d1_w'],
                               precision=hi) + raw['d1_b'])
    h = jax.nn.relu(jnp.einsum('npkc,oc->npko', h, raw['d2_w'],
                               precision=hi) + raw['d2_b'])
    fts_cat = jnp.concatenate([h, fts], axis=-1)
    t = jnp.einsum('npkd,odk->npo', pts_local, raw['xc_w'][:, :, 0, :],
                   precision=hi) + raw['xc_b']
    t = jax.nn.relu(t)
    t = jax.nn.relu(jnp.einsum('npi,oi->npo', t, raw['xd1_w'],
                               precision=hi) + raw['xd1_b'])
    Xf = jnp.einsum('npi,oi->npo', t, raw['xd2_w'], precision=hi) + raw['xd2_b']
    X = Xf.reshape(N_BATCH, P_REP, K_NBR, K_NBR)
    fX = jnp.einsum('npij,npjc->npic', X, fts_cat, precision=hi)
    dwf = raw['dw_w'][:, 0, 0, :].reshape(CF, DEPTH_MULT, K_NBR)
    dw = jnp.einsum('npkc,cjk->npcj', fX, dwf,
                    precision=hi).reshape(N_BATCH, P_REP, Q_DW) + raw['dw_b']
    return jax.nn.relu(jnp.einsum('npq,oq->npo', dw, raw['pw_w'][:, :, 0, 0],
                                  precision=hi))


# --------------------------------- main ---------------------------------------
if __name__ == "__main__":
    key = jax.random.PRNGKey(0)
    ks = jax.random.split(key, 16)

    rep_pt = jax.random.normal(ks[0], (N_BATCH, P_REP, DIMS), jnp.float32)
    pts    = jax.random.normal(ks[1], (N_BATCH, P_REP, K_NBR, DIMS), jnp.float32)
    fts    = jax.random.normal(ks[2], (N_BATCH, P_REP, K_NBR, C_IN), jnp.float32)

    def w(k, shape, scale=0.1):
        return scale * jax.random.normal(k, shape, jnp.float32)

    # Deterministic synthetic parameters, PyTorch-native shapes.
    raw = {
        'd1_w':  w(ks[3],  (C_MID, DIMS)),        'd1_b':  w(ks[4],  (C_MID,)),
        'd2_w':  w(ks[5],  (C_MID, C_MID)),       'd2_b':  w(ks[6],  (C_MID,)),
        'xc_w':  w(ks[7],  (KK, DIMS, 1, K_NBR)), 'xc_b':  w(ks[8],  (KK,)),
        'xd1_w': w(ks[9],  (KK, KK)),             'xd1_b': w(ks[10], (KK,)),
        'xd2_w': w(ks[11], (KK, KK)),             'xd2_b': w(ks[12], (KK,)),
        'dw_w':  w(ks[13], (Q_DW, 1, 1, K_NBR)),  'dw_b':  w(ks[14], (Q_DW,)),
        'pw_w':  w(ks[15], (C_OUT, Q_DW, 1, 1)),
    }
    slab = pack_params(raw)

    # tm=8 at this tiny M=16 gives grid=(2,) parallel steps; for production M
    # use the default tm=256 (or sweep 256..1024).
    out = xconv_pallas_jit(rep_pt, pts, fts, slab, tm=8)
    out = jax.block_until_ready(out)

    ref = xconv_reference(rep_pt, pts, fts, raw)
    assert out.shape == (N_BATCH, P_REP, C_OUT)
    # bf16 matmul operands (f32 accumulation) vs an f32-HIGHEST reference.
    assert np.allclose(np.asarray(out), np.asarray(ref), atol=2e-2, rtol=2e-2)

    print("KERNEL_OK")
</pallas_src>

<mosaic_0001>
module attributes {stable_mosaic.version = 11 : i64} {
  func.func @xconv_kernel(%arg0: i32, %arg1: memref<8x48xf32, #tpu.memory_space<vmem>>, %arg2: memref<416x256xbf16, #tpu.memory_space<vmem>>, %arg3: memref<8x16xf32, #tpu.memory_space<vmem>>) attributes {dimension_semantics = [#tpu.dimension_semantics<parallel>], iteration_bounds = array<i64: 2>, scalar_prefetch = 0 : i64, scratch_operands = 0 : i64, tpu.core_type = #tpu.core_type<tc>, window_params = [{transform_indices = @transform_0, window_bounds = array<i64: 8, 48>}, {pipeline_mode = #tpu.pipeline_mode<synchronous>, transform_indices = @transform_1, window_bounds = array<i64: 416, 256>}, {transform_indices = @transform_2, window_bounds = array<i64: 8, 16>}]} {
    %c0 = arith.constant 0 : index
    %c0_0 = arith.constant 0 : index
    %0 = vector.load %arg1[%c0, %c0_0] : memref<8x48xf32, #tpu.memory_space<vmem>>, vector<8x48xf32>
    %c0_1 = arith.constant 0 : index
    %c0_2 = arith.constant 0 : index
    %1 = vector.load %arg2[%c0_1, %c0_2] : memref<416x256xbf16, #tpu.memory_space<vmem>>, vector<48x48xbf16>
    %c352 = arith.constant 352 : index
    %c0_3 = arith.constant 0 : index
    %2 = vector.load %arg2[%c352, %c0_3] : memref<416x256xbf16, #tpu.memory_space<vmem>>, vector<1x48xbf16>
    %3 = arith.extf %2 : vector<1x48xbf16> to vector<1x48xf32>
    %4 = arith.truncf %0 : vector<8x48xf32> to vector<8x48xbf16>
    %cst = arith.constant dense<0.000000e+00> : vector<8x48xf32>
    %5 = tpu.matmul %4, %1, %cst {dimension_numbers = #tpu.dot_dimension_numbers<[1], [0], [0], [1], [0, 0, 1, 1], [], []>} : vector<8x48xbf16>, vector<48x48xbf16>, vector<8x48xf32> -> vector<8x48xf32>
    %6 = vector.broadcast %3 : vector<1x48xf32> to vector<8x48xf32>
    %7 = arith.addf %5, %6 : vector<8x48xf32>
    %cst_4 = arith.constant 0.000000e+00 : f32
    %8 = vector.broadcast %cst_4 : f32 to vector<8x48xf32>
    %9 = arith.maximumf %7, %8 : vector<8x48xf32>
    %c48 = arith.constant 48 : index
    %c0_5 = arith.constant 0 : index
    %10 = vector.load %arg2[%c48, %c0_5] : memref<416x256xbf16, #tpu.memory_space<vmem>>, vector<48x64xbf16>
    %11 = arith.truncf %0 : vector<8x48xf32> to vector<8x48xbf16>
    %cst_6 = arith.constant dense<0.000000e+00> : vector<8x64xf32>
    %12 = tpu.matmul %11, %10, %cst_6 {dimension_numbers = #tpu.dot_dimension_numbers<[1], [0], [0], [1], [0, 0, 1, 1], [], []>} : vector<8x48xbf16>, vector<48x64xbf16>, vector<8x64xf32> -> vector<8x64xf32>
    %c96 = arith.constant 96 : index
    %c0_7 = arith.constant 0 : index
    %13 = vector.load %arg2[%c96, %c0_7] : memref<416x256xbf16, #tpu.memory_space<vmem>>, vector<48x144xbf16>
    %c368 = arith.constant 368 : index
    %c0_8 = arith.constant 0 : index
    %14 = vector.load %arg2[%c368, %c0_8] : memref<416x256xbf16, #tpu.memory_space<vmem>>, vector<1x144xbf16>
    %15 = arith.extf %14 : vector<1x144xbf16> to vector<1x144xf32>
    %16 = arith.truncf %9 : vector<8x48xf32> to vector<8x48xbf16>
    %cst_9 = arith.constant dense<0.000000e+00> : vector<8x144xf32>
    %17 = tpu.matmul %16, %13, %cst_9 {dimension_numbers = #tpu.dot_dimension_numbers<[1], [0], [0], [1], [0, 0, 1, 1], [], []>} : vector<8x48xbf16>, vector<48x144xbf16>, vector<8x144xf32> -> vector<8x144xf32>
    %18 = vector.broadcast %15 : vector<1x144xf32> to vector<8x144xf32>
    %19 = arith.addf %17, %18 : vector<8x144xf32>
    %cst_10 = arith.constant 0.000000e+00 : f32
    %20 = vector.broadcast %cst_10 : f32 to vector<8x144xf32>
    %21 = arith.maximumf %19, %20 : vector<8x144xf32>
    %22 = vector.extract_strided_slice %21 {offsets = [0, 0], sizes = [8, 128], strides = [1, 1]} : vector<8x144xf32> to vector<8x128xf32>
    %23 = vector.extract_strided_slice %21 {offsets = [0, 128], sizes = [8, 16], strides = [1, 1]} : vector<8x144xf32> to vector<8x16xf32>
    %c144 = arith.constant 144 : index
    %c0_11 = arith.constant 0 : index
    %24 = vector.load %arg2[%c144, %c0_11] : memref<416x256xbf16, #tpu.memory_space<vmem>>, vector<16x192xbf16>
    %c384 = arith.constant 384 : index
    %c0_12 = arith.constant 0 : index
    %25 = vector.load %arg2[%c384, %c0_12] : memref<416x256xbf16, #tpu.memory_space<vmem>>, vector<1x192xbf16>
    %26 = arith.extf %25 : vector<1x192xbf16> to vector<1x192xf32>
    %27 = arith.truncf %23 : vector<8x16xf32> to vector<8x16xbf16>
    %cst_13 = arith.constant dense<0.000000e+00> : vector<8x192xf32>
    %28 = tpu.matmul %27, %24, %cst_13 {dimension_numbers = #tpu.dot_dimension_numbers<[1], [0], [0], [1], [0, 0, 1, 1], [], []>} : vector<8x16xbf16>, vector<16x192xbf16>, vector<8x192xf32> -> vector<8x192xf32>
    %29 = vector.broadcast %26 : vector<1x192xf32> to vector<8x192xf32>
    %30 = arith.addf %28, %29 : vector<8x192xf32>
    %31 = tpu.concatenate %22, %12 in 1 : vector<8x128xf32>, vector<8x64xf32> -> vector<8x192xf32>
    %32 = arith.mulf %30, %31 : vector<8x192xf32>
    %c160 = arith.constant 160 : index
    %c0_14 = arith.constant 0 : index
    %33 = vector.load %arg2[%c160, %c0_14] : memref<416x256xbf16, #tpu.memory_space<vmem>>, vector<192x16xbf16>
    %c400 = arith.constant 400 : index
    %c0_15 = arith.constant 0 : index
    %34 = vector.load %arg2[%c400, %c0_15] : memref<416x256xbf16, #tpu.memory_space<vmem>>, vector<1x16xbf16>
    %35 = arith.extf %34 : vector<1x16xbf16> to vector<1x16xf32>
    %36 = arith.truncf %32 : vector<8x192xf32> to vector<8x192xbf16>
    %cst_16 = arith.constant dense<0.000000e+00> : vector<8x16xf32>
    %37 = tpu.matmul %36, %33, %cst_16 {dimension_numbers = #tpu.dot_dimension_numbers<[1], [0], [0], [1], [0, 0, 1, 1], [], []>} : vector<8x192xbf16>, vector<192x16xbf16>, vector<8x16xf32> -> vector<8x16xf32>
    %38 = vector.broadcast %35 : vector<1x16xf32> to vector<8x16xf32>
    %39 = arith.addf %37, %38 : vector<8x16xf32>
    %cst_17 = arith.constant 0.000000e+00 : f32
    %40 = vector.broadcast %cst_17 : f32 to vector<8x16xf32>
    %41 = arith.maximumf %39, %40 : vector<8x16xf32>
    %c0_18 = arith.constant 0 : index
    %c0_19 = arith.constant 0 : index
    %42 = vector.load %arg3[%c0_18, %c0_19] : memref<8x16xf32, #tpu.memory_space<vmem>>, vector<8x16xf32>
    tpu.vector_store %arg3[%c0_18, %c0_19], %41 {strides = array<i32>} : memref<8x16xf32, #tpu.memory_space<vmem>>, vector<8x16xf32>,
    return
  }
  func.func @transform_0(%arg0: i32) -> (i32, i32) {
    %c0_i32 = arith.constant 0 : i32
    %c0_i32_0 = arith.constant 0 : i32
    return %arg0, %c0_i32 : i32, i32
  }
  func.func @transform_1(%arg0: i32) -> (i32, i32) {
    %c0_i32 = arith.constant 0 : i32
    %c0_i32_0 = arith.constant 0 : i32
    %c0_i32_1 = arith.constant 0 : i32
    return %c0_i32, %c0_i32_0 : i32, i32
  }
  func.func @transform_2(%arg0: i32) -> (i32, i32) {
    %c0_i32 = arith.constant 0 : i32
    %c0_i32_0 = arith.constant 0 : i32
    return %arg0, %c0_i32 : i32, i32
  }
}

</mosaic_0001>

<bundles_post_ra>
// kernel: xconv_pallas.1
= control target key start
LH: loop header
LB: loop body
LE: loop exit
PB: predicated region body
PF: predicated region fallthrough
CT: control target
= control target key end

     0   :  { %7 = vsyncpa [#allocation3], 0  ;;  %s1115_s0 = inlined_call_operand.vmem [shape: f32[16,48], index: 0, kind: input, shape index: {}]   ;;  %s1116_s1 = inlined_call_operand.vmem [shape: bf16[416,256], index: 1, kind: input, shape index: {}]   ;;  %s1117_s2 = inlined_call_operand.hbm [shape: f32[16,16], index: 2, kind: output, shape index: {}]  }
   0x1   :  { %9 = vsyncpa [#allocation3 + $0x1], 0  ;;  %s893_s9 = smov 0   ;;  %s895_s10 = smov 0  }
   0x2   :  { %s897_s11 = smov 0   ;;  %s899_s12 = smov 0  }
   0x3 LB: > { %s914_s13 = sadd.s32 4294967295, %s872_s12   ;;  %s669_s14 = sadd.s32 4294967294, %s872_s12   ;;  %s872_s12 = sphi %s899_s12, %s1123_s12   ;;  %s868_s11 = sphi %s897_s11, %s1122_s11   ;;  %s864_s10 = sphi %s895_s10, %s1121_s10   ;;  %s860_s9 = sphi %s893_s9, %s1120_s9  }
   0x4   : > { %s918_s15 = sadd.s32 1, %s872_s12   ;;  %s69_s16 = sadd.s32 1, %s868_s11 }
   0x5   : > { %s66_s17 = ssub.s32 %s872_s12, %s918_s15  ;;  %p79_p0 = scmp.ne.s32.totalorder %s868_s11, %s864_s10 }
   0x6   : > { %p67_p1 = scmp.eq.s32.totalorder %s66_s17, 0  ;;  %p80_p2 = scmp.eq.s32.totalorder %s914_s13, 1 }
   0x7   : > { %p85_p3 = scmp.ne.s32.totalorder %s864_s10, %s860_s9  ;;  %p86_p4 = scmp.eq.s32.totalorder %s669_s14, 1 }
   0x8   : > { %s929_s18 = scalar_select %p67_p1, %s868_s11, %s69_s16  }
   0x9   : > { %p931_p5 = por %p80_p2, %p79_p0  ;;  %p935_p6 = por %p86_p4, %p85_p3 }
   0xa   : > { %p672_p7 = scmp.ge.s32.totalorder %s872_s12, 1  ;;  %p114_p8 = scmp.lt.s32.totalorder %s872_s12, 3 }
   0xc   : > { %p115_p9 = pnand %p672_p7, %p114_p8 }
   0xd   : > { %v874_v0 = vmov (!%p115_p9), 0.0   ;;  %v780_v1 = vld [vmem:[%s1116_s1] ss:$8 sps:$4 sm:$0xff] (!%p115_p9)   ;;  %vm875_vm0 = vmmov (!%p115_p9), 0   ;;  %v781_v2 = vld [vmem:[%s1116_s1 + $0x10] ss:$8 sps:$4 sm:$0xff] (!%p115_p9)   ;;  %v150_v17 = vlaneseq (!%p115_p9) }
   0xe   : > { %118 = sbr.rel (%p115_p9) target bundleno = 915 (0x393), region = 28  ;;  %718 = vmatprep.subr.bf16.mxu0 (!%p115_p9), %v874_v0  ;;  %724 = vmatprep.mubr.msk.bf16.mxu0 (!%p115_p9), %vm875_vm0, %v874_v0  ;;  %p135_p10 = scmp.lt.s32.totalorder (!%p115_p9), %s914_s13, 1  ;;  %v782_v3 = vld [vmem:[%s1116_s1 + $0x20] ss:$8 sps:$4 sm:$0xff] (!%p115_p9)   ;;  %v783_v5 = vld [vmem:[%s1116_s1 + $0x30] ss:$8 sps:$4 sm:$0xff] (!%p115_p9)  }
   0xf   : > { %719 = vmatpush3.bf16.msra.mxu0 (!%p115_p9), %v780_v1  ;;  %vm172_vm1 = vcmask (!%p115_p9), 392192   ;;  %v784_v7 = vld [vmem:[%s1116_s1 + $0x40] ss:$8 sps:$4 sm:$0xff] (!%p115_p9)   ;;  %v785_v8 = vld [vmem:[%s1116_s1 + $0x50] ss:$8 sps:$4 sm:$0xff] (!%p115_p9)   ;;  %v876_v15 = vmov (!%p115_p9), 0  }
  0x10   : > { %720 = vmatprep.subr.bf16.mxu0 (!%p115_p9), %v874_v0  ;;  %v788_v9 = vld [vmem:[%s1116_s1 + $0x64] ss:$8 sps:$4 sm:$0xff] (!%p115_p9)   ;;  %v786_v10 = vld [vmem:[%s1116_s1 + $0x60] ss:$8 sps:$4 sm:$0xff] (!%p115_p9)   ;;  %v791_v11 = vld [vmem:[%s1116_s1 + $0x74] ss:$8 sps:$4 sm:$0xff] (!%p115_p9)   ;;  %554 = vmatprep.subr.bf16.mxu1 (!%p115_p9), %v876_v15 }
  0x11   : > { %v789_v12 = vld [vmem:[%s1116_s1 + $0x70] ss:$8 sps:$4 sm:$0xff] (!%p115_p9)   ;;  %v794_v13 = vld [vmem:[%s1116_s1 + $0x84] ss:$8 sps:$4 sm:$0xff] (!%p115_p9)   ;;  %v792_v14 = vld [vmem:[%s1116_s1 + $0x80] ss:$8 sps:$4 sm:$0xff] (!%p115_p9)  }
  0x12   : > { %v797_v16 = vld [vmem:[%s1116_s1 + $0x94] ss:$8 sps:$4 sm:$0xff] (!%p115_p9)   ;;  %v151_v18 = vshrl.u32 (!%p115_p9), %v150_v17, 7  ;;  %v147_v19 = vld [vmem:[%s1116_s1 + $0x160] sm:$0x1] (!%p115_p9)  ;;  %vm399_vm2 = vcmask (!%p115_p9), 130048  }
  0x13   : > { %721 = vmatpush3.bf16.msra.mxu0 (!%p115_p9), %v781_v2  ;;  %v148_v20 = vunpack.c.l.bf16 (!%p115_p9), %v147_v19  ;;  %v795_v29 = vld [vmem:[%s1116_s1 + $0x90] ss:$8 sps:$4 sm:$0xff] (!%p115_p9)   ;;  %v798_v35 = vld [vmem:[%s1116_s1 + $0xa0] ss:$8 sps:$4 sm:$0xff] (!%p115_p9)   ;;  %vm550_vm3 = vcmask (!%p115_p9), 523264   ;;  %s132_s29 = sand.u32 (!%p115_p9), 1, %s864_s10  }
  0x14   : > { %722 = vmatprep.subr.bf16.mxu0 (!%p115_p9), %v874_v0  ;;  %v994_v21 = vsub.s32 (!%p115_p9), 0, %v151_v18  ;;  %555 = vmatpush1.bf16.msra.mxu1 (!%p115_p9), %v798_v35  ;;  %v799_v36 = vld [vmem:[%s1116_s1 + $0xb0] ss:$8 sps:$4 sm:$0xff] (!%p115_p9)   ;;  %v800_v37 = vld [vmem:[%s1116_s1 + $0xc0] ss:$8 sps:$4 sm:$0xff] (!%p115_p9)   ;;  %s673_s30 = sshll.u32 (!%p115_p9), %s132_s29, 3 }
  0x15   : > { %s136_s25 = scalar_select %p135_p10, %s914_s13, 1  ;;  %556 = vmatprep.subr.bf16.mxu1 %v876_v15  ;;  %v801_v38 = vld [vmem:[%s1116_s1 + $0xd0] ss:$8 sps:$4 sm:$0xff]   ;;  %v802_v39 = vld [vmem:[%s1116_s1 + $0xe0] ss:$8 sps:$4 sm:$0xff]  }
  0x16   : > { %v153_v22 = vrot.slane %v148_v20, %v994_v21  ;;  %v803_v40 = vld [vmem:[%s1116_s1 + $0xf0] ss:$8 sps:$4 sm:$0xff]   ;;  %v804_v41 = vld [vmem:[%s1116_s1 + $0x100] ss:$8 sps:$4 sm:$0xff]   ;;  %s134_s4 = scalar_lea.vmem [#allocation2], %s673_s30  ;;  %s877_s16 = smov [#allocation2]  }
  0x17   : > { %s674_s28 = sshll.u32 %s136_s25, 3  ;;  %723 = vmatpush3.bf16.msra.mxu0 %v782_v3  ;;  %v805_v42 = vld [vmem:[%s1116_s1 + $0x110] ss:$8 sps:$4 sm:$0xff]   ;;  %v806_v43 = vld [vmem:[%s1116_s1 + $0x120] ss:$8 sps:$4 sm:$0xff]   ;;  %s610_s5 = sshll.u32 %s134_s4, 4  ;;  %s1074_s5 = int_to_ptr.vmem [resolvable:$true] %s610_s5 }
  0x18   : > { %s138_s3 = scalar_lea.vmem %s1115_s0, %s674_s28  ;;  %728 = vmatprep.subr.bf16.mxu0 %v874_v0  ;;  %557 = vmatpush1.bf16.msra.mxu1 %v799_v36  ;;  %v807_v44 = vld [vmem:[%s1116_s1 + $0x130] ss:$8 sps:$4 sm:$0xff]   ;;  %v808_v55 = vld [vmem:[%s1116_s1 + $0x140] ss:$8 sps:$4 sm:$0xff]   ;;  %s810_s14 = scalar_lea.vmem %s1074_s5, 128 }
  0x19   : > { %v140_v4 = vld [vmem:[%s138_s3] sm:$0xff]  ;;  %558 = vmatprep.subr.bf16.mxu1 %v876_v15  ;;  %v287_v45 = vld [vmem:[%s1116_s1 + $0x170] sm:$0x11]  ;;  %s707_s3 = sshll.u32 %s914_s13, 7  ;;  %s597_s13 = scalar_lea.sflag [#allocation3], %s132_s29 }
  0x1a   : > { %v149_v6 = vpack.c.bf16 %v140_v4, %v140_v4  ;;  %v289_v46 = vunpack.c.h.bf16 %v287_v45  ;;  %v809_v56 = vld [vmem:[%s1116_s1 + $0x150] ss:$8 sps:$4 sm:$0xff]   ;;  %v288_v57 = vunpack.c.l.bf16 %v287_v45  ;;  %v377_v58 = vld [vmem:[%s1116_s1 + $0x180] sm:$0x11]  ;;  %s1072_s8 = scalar_lea.hbm %s1117_s2, %s707_s3  ;;  %p811_p11 = scmp.ne.s32.totalorder %s1074_s5, %s810_s14 }
  0x1b   : > { %v378_v60 = vunpack.c.l.bf16 %v377_v58  ;;  %v379_v61 = vunpack.c.h.bf16 %v377_v58  ;;  %s814_s17 = sshll.u32 %s877_s16, 4  ;;  %s815_s17 = int_to_ptr.vmem [resolvable:$false] %s814_s17 }
  0x1c   : > { %725 = vmatmul.mubr.msk.bf16.vlgmr.msra.gmra.mrb[0].mxu0 %vm172_vm1, %v149_v6  ;;  %559 = vmatpush1.bf16.msra.mxu1 %v800_v37  ;;  %v298_v47 = vrot.slane %v289_v46, %v994_v21  ;;  %v294_v59 = vrot.slane %v288_v57, %v994_v21  ;;  %p812_p12 = pnand %p811_p11, %p931_p5  ;;  %s816_s21 = scalar_lea.vmem %s815_s17, 256 }
  0x1d   : > { %729 = vmatpush3.bf16.msra.mxu0 %v783_v5  ;;  %734 = vmatprep.mubr.msk.bf16.mxu0 %vm875_vm0, %v874_v0  ;;  %v384_v63 = vrot.slane %v378_v60, %v994_v21  ;;  %p817_p0 = scmp.lt.s32.totalorder %s1074_s5, %s815_s17  ;;  %p818_p1 = scmp.lt.s32.totalorder %s816_s21, %s810_s14 }
  0x1e   : > { %730 = vmatprep.subr.bf16.mxu0 %v874_v0  ;;  %560 = vmatprep.subr.bf16.mxu1 %v876_v15  ;;  %p813_p13 = pneg %p812_p12 }
  0x1f   : > { %p819_p2 = por %p818_p1, %p817_p0 }
  0x20   : > { %561 = vmatpush1.bf16.msra.mxu1 %v801_v38 }
  0x21   : > { %731 = vmatpush3.bf16.msra.mxu0 %v784_v7  ;;  %562 = vmatprep.subr.bf16.mxu1 %v876_v15  ;;  %p820_p3 = pnand %p819_p2, %p813_p13 }
  0x22   : > { %732 = vmatprep.subr.bf16.mxu0 %v874_v0  ;;  %v388_v0 = vrot.slane %v379_v61, %v994_v21 }
  0x24   : > { %563 = vmatpush1.bf16.msra.mxu1 %v802_v39 }
  0x25   : > { %733 = vmatpush3.bf16.msra.mxu0 %v785_v8  ;;  %564 = vmatprep.subr.bf16.mxu1 %v876_v15 }
  0x26   : > { %332 = vmatprep.subr.bf16.mxu0 %v788_v9 }
  0x28   : > { %735 = vmatmul.mubr.msk.bf16.vlgmr.msra.gmra.mrb[4].mxu0 %vm172_vm1, %v149_v6  ;;  %565 = vmatpush1.bf16.msra.mxu1 %v803_v40 }
  0x29   : > { %333 = vmatpush1.bf16.msra.mxu0 %v786_v10  ;;  %364 = vmatprep.mubr.bf16.mxu0 %v876_v15 }
  0x2a   : > { %334 = vmatprep.subr.bf16.mxu0 %v791_v11  ;;  %566 = vmatprep.subr.bf16.mxu1 %v876_v15 }
  0x2c   : > { %567 = vmatpush1.bf16.msra.mxu1 %v804_v41 }
  0x2d   : > { %335 = vmatpush1.bf16.msra.mxu0 %v789_v12  ;;  %568 = vmatprep.subr.bf16.mxu1 %v876_v15  ;;  %v470_v12 = vld [vmem:[%s1116_s1 + $0x190] sm:$0x1] }
  0x2e   : > { %336 = vmatprep.subr.bf16.mxu0 %v794_v13  ;;  %v471_v13 = vunpack.c.l.bf16 %v470_v12 }
  0x30   : > { %569 = vmatpush1.bf16.msra.mxu1 %v805_v42 }
  0x31   : > { %337 = vmatpush1.bf16.msra.mxu0 %v792_v14  ;;  %570 = vmatprep.subr.bf16.mxu1 %v876_v15  ;;  %v477_v14 = vrot.slane %v471_v13, %v994_v21 }
  0x32   : > { %403 = vmatprep.subr.bf16.mxu0 %v797_v16 }
  0x34   : > { %571 = vmatpush1.bf16.msra.mxu1 %v806_v43 }
  0x35   : > { %572 = vmatprep.subr.bf16.mxu1 %v876_v15 }
  0x38   : > { %573 = vmatpush1.bf16.msra.mxu1 %v807_v44 }
  0x39   : > { %574 = vmatprep.subr.bf16.mxu1 %v876_v15 }
  0x3c   : > { %575 = vmatpush1.bf16.msra.mxu1 %v808_v55 }
  0x3d   : > { %576 = vmatprep.subr.bf16.mxu1 %v876_v15 }
  0x40   : > { %577 = vmatpush1.bf16.msra.mxu1 %v809_v56 }
  0xef   : > { %v210_v23 = vpop.f32.mrb[0].mxu0 }
  0xf0   : > { %v211_v24 = vadd.f32 %v210_v23, %v153_v22  ;;  %v726_v25 = vpop.f32.mrb[1].mxu0 }
  0xf1   : > { %v213_v26 = vpop.f32.mrb[2].mxu0 }
  0xf2   : > { %v216_v27 = vmax.f32 %v211_v24, 0.0  ;;  %v727_v28 = vpop.f32.mrb[3].mxu0 }
  0xf4   : > { %v290_v30 = vpack.c.bf16 %v216_v27, %v216_v27 }
  0xf6   : > { %689 = vmatmul.mubr.msk.bf16.vlgmr.msra.gmra.mrb[8].mxu0 %vm172_vm1, %v290_v30 }
  0xf7   : > { %404 = vmatpush1.bf16.msra.mxu0 %v795_v29  ;;  %435 = vmatprep.mubr.bf16.mxu0 %v876_v15 }
  0xfb   : > { %v1002_v31 = vpop.f32.mrb[4].mxu0 }
  0xfc   : > { %v736_v32 = vpop.f32.mrb[5].mxu0 }
  0xfd   : > { %v278_v33 = vpop.f32.mrb[6].mxu0 }
  0xfe   : > { %v737_v34 = vpop.f32.mrb[7].mxu0 }
 0x1c9   : > { %v366_v48 = vpop.f32.mrb[8].mxu0 }
 0x1ca   : > { %v368_v49 = vpop.f32.mrb[9].mxu0  ;;  %v367_v62 = vadd.f32 %v366_v48, %v294_v59 }
 0x1cb   : > { %v369_v50 = vadd.f32 %v368_v49, %v298_v47  ;;  %v370_v51 = vpop.f32.mrb[10].mxu0 }
 0x1cc   : > { %v371_v52 = vpop.f32.mrb[11].mxu0  ;;  %v373_v2 = vmax.f32 %v367_v62, 0.0 }
 0x1cd   : > { %v374_v53 = vmax.f32 %v369_v50, 0.0 }
 0x1cf   : > { %v380_v54 = vpack.c.bf16 %v374_v53, %v374_v53 }
 0x1d1   : > { %692 = vmatmul.mubr.msk.bf16.vlgmr.msra.gmra.mrb[12].mxu0 %vm399_vm2, %v380_v54 }
 0x2a4   : > { %v437_v1 = vpop.f32.mrb[12].mxu0 }
 0x2a5   : > { %v438_v3 = vadd.f32 %v437_v1, %v384_v63  ;;  %v439_v4 = vpop.f32.mrb[13].mxu0 }
 0x2a6   : > { %v440_v5 = vadd.f32 %v439_v4, %v388_v0  ;;  %v441_v6 = vpop.f32.mrb[14].mxu0 }
 0x2a7   : > { %v444_v7 = vmul.f32 %v438_v3, %v373_v2  ;;  %v442_v8 = vpop.f32.mrb[15].mxu0 }
 0x2a8   : > { %v445_v9 = vmul.f32 %v440_v5, %v1002_v31 }
 0x2a9   : > { %v472_v11 = vpack.c.bf16 %v444_v7, %v444_v7 }
 0x2aa   : > { %v473_v10 = vpack.c.bf16 %v445_v9, %v445_v9 }
 0x2ac   : > { %705 = vmatprep.mubr.msk.bf16.mxu1 %vm550_vm3, %v473_v10 }
 0x2ad   : > { %587 = vmatmul.mubr.bf16.vlgmr.msra.gmra.mrb[0].mxu1 %v472_v11 }
 0x380   : > { %v588_v15 = vpop.f32.mrb[0].mxu1 }
 0x381   : > { %v589_v16 = vadd.f32 %v588_v15, %v477_v14  ;;  %v590_v17 = vpop.f32.mrb[1].mxu1 }
 0x382   : > { %v591_v18 = vpop.f32.mrb[2].mxu1 }
 0x383   : > { %v594_v19 = vmax.f32 %v589_v16, 0.0  ;;  %v592_v20 = vpop.f32.mrb[3].mxu1 }
 0x385   : > { %595 = vst.msk [vmem:[%s134_s4] sm:$0xff] %vm399_vm2, %v594_v19 }
 0x386   : > { %823 = shalt.err (!%p820_p3)
}
 0x387   : > { %s824_s22 = scalar_lea.hbm %s1072_s8, 128  ;;  %s828_s25 = scalar_lea.hbm %s1117_s2, 256 }
 0x388   : > { %p825_p4 = scmp.ne.s32.totalorder %s1072_s8, %s824_s22  ;;  %p829_p9 = scmp.lt.u32.totalorder %s1072_s8, %s1117_s2 }
 0x389   : > { %p830_p10 = scmp.lt.u32.totalorder %s828_s25, %s824_s22  ;;  %p832_p12 = scmp.lt.u32.totalorder %s824_s22, %s1072_s8 }
 0x38a   : > { %p826_p7 = pnand %p825_p4, %p931_p5 }
 0x38b   : > { %p831_p11 = por %p830_p10, %p829_p9 }
 0x38c   : > { %p827_p8 = pneg %p826_p7 }
 0x38d   : > { %p833_p13 = por %p832_p12, %p831_p11 }
 0x38f   : > { %p834_p0 = pnand %p833_p13, %p827_p8 }
 0x391   : > { %837 = shalt.err (!%p834_p0)
}
 0x392   : > { %738 = dma.vmem_to_hbm [thread:$0]  (%p931_p5), %s1074_s5, 128, %s1072_s8, %s597_s13  }
 0x393 PF: > { %p744_p1 = scmp.ge.s32.totalorder %s872_s12, 2  ;;  %s622_s28 = sand.u32 1, %s860_s9  }
 0x394   : > { %s623_s29 = scalar_lea.sflag [#allocation3], %s622_s28 }
 0x395   : > { %p741_p2 = pnand %p744_p1, %p935_p6 }
 0x397   : > { %855 = dma.done.wait (!%p741_p2), %s623_s29, 128  }
 0x398   : > { %857 = vsyncadd (!%p741_p2), %s623_s29, 4294967168  ;;  %p12_p3 = scmp.ge.s32.totalorder %s918_s15, 4   ;;  %s1120_s9 = smov %s864_s10 }
 0x399   : > { %s1121_s10 = smov %s868_s11  ;;  %s1122_s11 = smov %s929_s18 }
 0x39a   : > { %s1123_s12 = smov %s918_s15  ;;  %14 = sbr.rel (!%p12_p3) target bundleno = 3 (0x3), region = 63 }
 0x3a1   :  { %628 = vsyncpa [#allocation3], 1 }
 0x3a2   :  { %630 = vsyncpa [#allocation3 + $0x1], 1 }

</bundles_post_ra>
